<compile_context>
chip_gen: v7x
topology: tpu7x:2x2x1
jax: 0.10.0
libtpu: 0.0.40
codegen_flags: <defaults>
</compile_context>

<pallas_src>
import jax
import jax.numpy as jnp
from jax import lax
from jax.experimental import pallas as pl
from jax.experimental.pallas import tpu as pltpu

EPS = 1e-5                  # nn.BatchNorm1d default eps
TARGET_LANES = 128          # packed lane width; set 256 to fill v6e/v7x's 256-wide MXU
MAX_ROW_TILE = 1024         # packed rows per grid step (1024 x 128 x 4B = 512 KiB/tile)
MATMUL_DTYPE = jnp.float32  # set jnp.bfloat16 on v5e/v6e/v7x for MXU speed (loosen tol)


def _mm(a, b):
    return jnp.dot(a.astype(MATMUL_DTYPE), b.astype(MATMUL_DTYPE),
                   preferred_element_type=jnp.float32)


# ---------------------------------------------------------------------------
# Fused kernel: all MixerLayers on one (TM, CP) lane-dense activation tile.
#   packed[g*L + l, tb*C + c] = x[g*TBL + tb, l, c]
# TimeMixer   : per TMI-row chunk, Y = kron(I_tgb, Wt) @ X  (block-diag left matmul)
# FeatureMixer: whole tile,        H = relu(X @ kron(I_TBL, W1') + b1'), Y = H @ kron(I_TBL, W2^T) + b2
# Weights of all blocks are stacked on a leading NBLOCKS axis and stay VMEM-resident.
# ---------------------------------------------------------------------------
def _fused_mixer_kernel(x_ref, wt_ref, tsc_ref, tsh_ref,
                        w1_ref, b1_ref, w2_ref, b2_ref, o_ref):
    nblocks = wt_ref.shape[0]
    tmi = wt_ref.shape[1]                     # rows per TimeMixer chunk (tgb * L)
    n_chunks = o_ref.shape[0] // tmi          # chunks per grid tile (static)

    o_ref[...] = x_ref[...]                   # working buffer = output tile (aliased HBM)

    def layer(nb, carry):
        wt = wt_ref[nb]                       # (TMI, TMI) block-diag kron(I_tgb, Wt)
        tsc = tsc_ref[nb]                     # (1, CP)   BN scale (per lane)
        tsh = tsh_ref[nb]                     # (TMI, CP) rowsum(Wt)*t + bt (folded BN shift)

        # ---- TimeMixer: lane-dense (TMI,TMI)@(TMI,CP) per chunk ----
        def time_chunk(ci, c):
            r0 = pl.multiple_of(ci * tmi, tmi)
            xc = o_ref[pl.ds(r0, tmi), :]
            z = _mm(wt, xc)
            o_ref[pl.ds(r0, tmi), :] = xc + jnp.maximum(z * tsc + tsh, 0.0)
            return c
        lax.fori_loop(0, n_chunks, time_chunk, 0, unroll=True)

        # ---- FeatureMixer: full (TM,CP)@(CP,CP) matmuls, BN folded into W1'/b1' ----
        # TODO(synk): nn.Dropout reproduced in eval mode (identity); training RNG masking not emitted.
        xt = o_ref[...]
        h = jnp.maximum(_mm(xt, w1_ref[nb]) + b1_ref[nb], 0.0)
        y = _mm(h, w2_ref[nb]) + b2_ref[nb]
        o_ref[...] = xt + y
        return carry

    lax.fori_loop(0, nblocks, layer, 0, unroll=True)


def tsmixer_forward_pallas(x, block_params, proj_params):
    """x: (B, L, C) float32.
    block_params: tuple of (tm_params, fm_params) per MixerLayer, where
      tm_params = (gamma, beta, mean, var, Wt (L,L), bt (L,))
      fm_params = (gamma, beta, mean, var, W1 (C,C), b1 (C,), W2 (C,C), b2 (C,))
    proj_params = (Wp (H,L), bp (H,))."""
    B, L, C = x.shape

    # ---- lane packing: TBL batch items per 128-lane row ----
    tbl = TARGET_LANES // C if (C <= TARGET_LANES and TARGET_LANES % C == 0) else 1
    CP = tbl * C
    nG = -(-B // tbl)                       # batch groups
    B_pad = nG * tbl

    # ---- sublane chunking for the block-diagonal time mix (TMI multiple of 8) ----
    tgb = min(max(1, TARGET_LANES // L), nG)
    while (tgb * L) % 8 != 0:
        tgb += 1
    TMI = tgb * L

    nG_pad = -(-nG // tgb) * tgb
    n_chunks = nG_pad // tgb
    chunks_per_tile = max(1, min(n_chunks, MAX_ROW_TILE // TMI))
    if n_chunks >= 2:                       # >=2 grid steps so both v7x TCs get work
        chunks_per_tile = min(chunks_per_tile, (n_chunks + 1) // 2)
    TM = chunks_per_tile * TMI
    n_chunks_pad = -(-n_chunks // chunks_per_tile) * chunks_per_tile
    rows_pad = n_chunks_pad * TMI
    grid = (n_chunks_pad // chunks_per_tile,)

    # ---- pack x: (B, L, C) -> (rows_pad, CP), packed[g*L+l, tb*C+c] = x[g*tbl+tb, l, c]
    xp = x if B_pad == B else jnp.pad(x, ((0, B_pad - B), (0, 0), (0, 0)))
    xp = xp.reshape(nG, tbl, L, C).transpose(0, 2, 1, 3).reshape(nG * L, CP)
    if rows_pad != nG * L:
        xp = jnp.pad(xp, ((0, rows_pad - nG * L), (0, 0)))

    # ---- fold eval-mode BatchNorm and build lane/sublane block-diagonal weights ----
    eye_lane = jnp.eye(tbl, dtype=jnp.float32)
    eye_time = jnp.eye(tgb, dtype=jnp.float32)
    wt_l, tsc_l, tsh_l, w1_l, b1_l, w2_l, b2_l = [], [], [], [], [], [], []
    for tm_params, fm_params in block_params:
        g, be, mu, var, wt, bt = tm_params
        s = g * lax.rsqrt(var + EPS)                      # (C,)
        t = be - mu * s                                   # (C,)
        wt_l.append(jnp.kron(eye_time, wt))               # (TMI, TMI)
        tsc_l.append(jnp.tile(s, tbl).reshape(1, CP))     # (1, CP)
        shift = wt.sum(axis=1)[:, None] * t[None, :] + bt[:, None]   # (L, C)
        tsh_l.append(jnp.tile(shift, (tgb, tbl)))         # (TMI, CP)

        g2, be2, mu2, var2, w1, b1, w2, b2 = fm_params
        s2 = g2 * lax.rsqrt(var2 + EPS)
        t2 = be2 - mu2 * s2
        w1_l.append(jnp.kron(eye_lane, s2[:, None] * w1.T))           # (CP, CP) BN folded
        b1_l.append(jnp.tile(t2 @ w1.T + b1, tbl).reshape(1, CP))
        w2_l.append(jnp.kron(eye_lane, w2.T))                         # (CP, CP)
        b2_l.append(jnp.tile(b2, tbl).reshape(1, CP))

    wt_blk = jnp.stack(wt_l); tsc_blk = jnp.stack(tsc_l); tsh_blk = jnp.stack(tsh_l)
    w1_blk = jnp.stack(w1_l); b1_blk = jnp.stack(b1_l)
    w2_blk = jnp.stack(w2_l); b2_blk = jnp.stack(b2_l)

    row_spec = pl.BlockSpec((TM, CP), lambda i: (i, 0))

    def resident(arr):        # full-array block, constant index_map -> stays in VMEM
        shp = arr.shape
        return pl.BlockSpec(shp, lambda i, _n=len(shp): (0,) * _n)

    # NOTE: input_output_aliases={0:0} is safe only because in/out row_specs are
    # identical and each input tile is DMA'd in before its output tile is written.
    out = pl.pallas_call(
        _fused_mixer_kernel,
        out_shape=jax.ShapeDtypeStruct((rows_pad, CP), jnp.float32),
        grid=grid,
        in_specs=[row_spec,
                  resident(wt_blk), resident(tsc_blk), resident(tsh_blk),
                  resident(w1_blk), resident(b1_blk),
                  resident(w2_blk), resident(b2_blk)],
        out_specs=row_spec,
        input_output_aliases={0: 0},
        compiler_params=pltpu.CompilerParams(
            dimension_semantics=("parallel",)),
    )(xp, wt_blk, tsc_blk, tsh_blk, w1_blk, b1_blk, w2_blk, b2_blk)

    # ---- unpack and temporal projection on feature channel 0 ----
    # Per perf review: the (B,L)@(L,H) channel-0 GEMV is launch-overhead in a Pallas
    # call (4-lane output); it stays in plain JAX / XLA.
    x_out = (out[:nG * L].reshape(nG, L, tbl, C)
             .transpose(0, 2, 1, 3).reshape(B_pad, L, C)[:B])
    wp, bp = proj_params
    return x_out[:, :, 0] @ wp.T + bp


tsmixer_forward = jax.jit(tsmixer_forward_pallas)


# ---------------------------------------------------------------------------
# Pure-JAX reference (eval-mode PyTorch semantics).
# ---------------------------------------------------------------------------
def _bn_eval(x, gamma, beta, mean, var):
    return (x - mean) * (gamma * lax.rsqrt(var + EPS)) + beta


def _time_mixer_ref(x, params):
    gamma, beta, mean, var, wt, bt = params
    xn = _bn_eval(x, gamma, beta, mean, var)
    y = jnp.einsum('lk,bkc->blc', wt, xn) + bt[None, :, None]
    return x + jnp.maximum(y, 0.0)


def _feature_mixer_ref(x, params):
    gamma, beta, mean, var, w1, b1, w2, b2 = params
    xn = _bn_eval(x, gamma, beta, mean, var)
    h = jnp.maximum(xn @ w1.T + b1, 0.0)
    return x + (h @ w2.T + b2)


def tsmixer_ref(x, block_params, proj_params):
    for tm_params, fm_params in block_params:
        x = _time_mixer_ref(x, tm_params)
        x = _feature_mixer_ref(x, fm_params)
    wp, bp = proj_params
    y = jnp.einsum('blc,hl->bhc', x, wp) + bp[None, :, None]
    return y[:, :, 0]


if __name__ == "__main__":
    B, L, C, H, NBLOCKS = 2, 8, 32, 4, 2    # batch, seq_len, num_features, horizon, blocks

    key = jax.random.PRNGKey(0)
    key, kx = jax.random.split(key)
    x = jax.random.normal(kx, (B, L, C), dtype=jnp.float32)

    def bn_params(k, n):
        k1, k2, k3, k4 = jax.random.split(k, 4)
        gamma = 1.0 + 0.1 * jax.random.normal(k1, (n,), dtype=jnp.float32)
        beta = 0.1 * jax.random.normal(k2, (n,), dtype=jnp.float32)
        mean = 0.1 * jax.random.normal(k3, (n,), dtype=jnp.float32)
        var = jax.random.uniform(k4, (n,), dtype=jnp.float32, minval=0.5, maxval=1.5)
        return gamma, beta, mean, var

    def linear_params(k, n_out, n_in):
        k1, k2 = jax.random.split(k)
        w = 0.1 * jax.random.normal(k1, (n_out, n_in), dtype=jnp.float32)
        b = 0.1 * jax.random.normal(k2, (n_out,), dtype=jnp.float32)
        return w, b

    block_params = []
    for _ in range(NBLOCKS):
        key, k1, k2, k3, k4, k5 = jax.random.split(key, 6)
        wt, bt = linear_params(k2, L, L)
        tm_params = (*bn_params(k1, C), wt, bt)
        w1, b1 = linear_params(k4, C, C)
        w2, b2 = linear_params(k5, C, C)
        fm_params = (*bn_params(k3, C), w1, b1, w2, b2)
        block_params.append((tm_params, fm_params))
    block_params = tuple(block_params)

    key, kp = jax.random.split(key)
    proj_params = linear_params(kp, H, L)    # (Wp: (H, L), bp: (H,))

    out = jax.block_until_ready(tsmixer_forward(x, block_params, proj_params))
    ref = jax.block_until_ready(tsmixer_ref(x, block_params, proj_params))

    assert out.shape == (B, H), out.shape
    assert jnp.allclose(out, ref, atol=1e-3, rtol=1e-3), float(jnp.max(jnp.abs(out - ref)))
    print("KERNEL_OK")
</pallas_src>

<mosaic_0001>
module attributes {stable_mosaic.version = 11 : i64} {
  func.func @_fused_mixer_kernel(%arg0: i32, %arg1: memref<8x128xf32, #tpu.memory_space<vmem>>, %arg2: memref<2x8x8xf32, #tpu.memory_space<vmem>>, %arg3: memref<2x1x128xf32, #tpu.memory_space<vmem>>, %arg4: memref<2x8x128xf32, #tpu.memory_space<vmem>>, %arg5: memref<2x128x128xf32, #tpu.memory_space<vmem>>, %arg6: memref<2x1x128xf32, #tpu.memory_space<vmem>>, %arg7: memref<2x128x128xf32, #tpu.memory_space<vmem>>, %arg8: memref<2x1x128xf32, #tpu.memory_space<vmem>>, %arg9: memref<8x128xf32, #tpu.memory_space<vmem>>) attributes {dimension_semantics = [#tpu.dimension_semantics<parallel>], iteration_bounds = array<i64: 1>, scalar_prefetch = 0 : i64, scratch_operands = 0 : i64, tpu.core_type = #tpu.core_type<tc>, window_params = [{transform_indices = @transform_0, window_bounds = array<i64: 8, 128>}, {pipeline_mode = #tpu.pipeline_mode<synchronous>, transform_indices = @transform_1, window_bounds = array<i64: 2, 8, 8>}, {pipeline_mode = #tpu.pipeline_mode<synchronous>, transform_indices = @transform_2, window_bounds = array<i64: 2, 1, 128>}, {pipeline_mode = #tpu.pipeline_mode<synchronous>, transform_indices = @transform_3, window_bounds = array<i64: 2, 8, 128>}, {pipeline_mode = #tpu.pipeline_mode<synchronous>, transform_indices = @transform_4, window_bounds = array<i64: 2, 128, 128>}, {pipeline_mode = #tpu.pipeline_mode<synchronous>, transform_indices = @transform_5, window_bounds = array<i64: 2, 1, 128>}, {pipeline_mode = #tpu.pipeline_mode<synchronous>, transform_indices = @transform_6, window_bounds = array<i64: 2, 128, 128>}, {pipeline_mode = #tpu.pipeline_mode<synchronous>, transform_indices = @transform_7, window_bounds = array<i64: 2, 1, 128>}, {transform_indices = @transform_8, window_bounds = array<i64: 8, 128>}]} {
    %c0 = arith.constant 0 : index
    %c0_0 = arith.constant 0 : index
    %0 = vector.load %arg1[%c0, %c0_0] : memref<8x128xf32, #tpu.memory_space<vmem>>, vector<8x128xf32>
    %c0_1 = arith.constant 0 : index
    %c0_2 = arith.constant 0 : index
    %1 = vector.load %arg9[%c0_1, %c0_2] : memref<8x128xf32, #tpu.memory_space<vmem>>, vector<8x128xf32>
    tpu.vector_store %arg9[%c0_1, %c0_2], %0 {strides = array<i32>} : memref<8x128xf32, #tpu.memory_space<vmem>>, vector<8x128xf32>,
    %c0_i32 = arith.constant 0 : i32
    %2 = arith.index_cast %c0_i32 : i32 to index
    %c0_3 = arith.constant 0 : index
    %c0_4 = arith.constant 0 : index
    %3 = vector.load %arg2[%2, %c0_3, %c0_4] : memref<2x8x8xf32, #tpu.memory_space<vmem>>, vector<1x8x8xf32>
    %4 = vector.shape_cast %3 : vector<1x8x8xf32> to vector<8x8xf32>
    %5 = arith.index_cast %c0_i32 : i32 to index
    %c0_5 = arith.constant 0 : index
    %c0_6 = arith.constant 0 : index
    %6 = vector.load %arg3[%5, %c0_5, %c0_6] : memref<2x1x128xf32, #tpu.memory_space<vmem>>, vector<1x1x128xf32>
    %7 = vector.shape_cast %6 : vector<1x1x128xf32> to vector<1x128xf32>
    %8 = arith.index_cast %c0_i32 : i32 to index
    %c0_7 = arith.constant 0 : index
    %c0_8 = arith.constant 0 : index
    %9 = vector.load %arg4[%8, %c0_7, %c0_8] : memref<2x8x128xf32, #tpu.memory_space<vmem>>, vector<1x8x128xf32>
    %10 = vector.shape_cast %9 : vector<1x8x128xf32> to vector<8x128xf32>
    %c0_i32_9 = arith.constant 0 : i32
    %c8_i32 = arith.constant 8 : i32
    %11 = arith.muli %c0_i32_9, %c8_i32 : i32
    %12 = tpu.assume_multiple %11, 8 : i32
    %13 = arith.index_cast %12 : i32 to index
    %c0_10 = arith.constant 0 : index
    %14 = vector.load %arg9[%13, %c0_10] : memref<8x128xf32, #tpu.memory_space<vmem>>, vector<8x128xf32>
    %cst = arith.constant dense<0.000000e+00> : vector<8x128xf32>
    %15 = tpu.matmul %4, %14, %cst {dimension_numbers = #tpu.dot_dimension_numbers<[1], [0], [0], [1], [0, 0, 1, 1], [], []>} : vector<8x8xf32>, vector<8x128xf32>, vector<8x128xf32> -> vector<8x128xf32>
    %16 = vector.broadcast %7 : vector<1x128xf32> to vector<8x128xf32>
    %17 = arith.mulf %15, %16 : vector<8x128xf32>
    %18 = arith.addf %17, %10 : vector<8x128xf32>
    %cst_11 = arith.constant 0.000000e+00 : f32
    %19 = vector.broadcast %cst_11 : f32 to vector<8x128xf32>
    %20 = arith.maximumf %18, %19 : vector<8x128xf32>
    %21 = arith.addf %14, %20 : vector<8x128xf32>
    %22 = arith.index_cast %12 : i32 to index
    %c0_12 = arith.constant 0 : index
    %23 = vector.load %arg9[%22, %c0_12] : memref<8x128xf32, #tpu.memory_space<vmem>>, vector<8x128xf32>
    tpu.vector_store %arg9[%22, %c0_12], %21 {strides = array<i32>} : memref<8x128xf32, #tpu.memory_space<vmem>>, vector<8x128xf32>,
    %c1_i32 = arith.constant 1 : i32
    %c0_13 = arith.constant 0 : index
    %c0_14 = arith.constant 0 : index
    %24 = vector.load %arg9[%c0_13, %c0_14] : memref<8x128xf32, #tpu.memory_space<vmem>>, vector<8x128xf32>
    %25 = arith.index_cast %c0_i32 : i32 to index
    %c0_15 = arith.constant 0 : index
    %c0_16 = arith.constant 0 : index
    %26 = vector.load %arg5[%25, %c0_15, %c0_16] : memref<2x128x128xf32, #tpu.memory_space<vmem>>, vector<1x128x128xf32>
    %27 = vector.shape_cast %26 : vector<1x128x128xf32> to vector<128x128xf32>
    %cst_17 = arith.constant dense<0.000000e+00> : vector<8x128xf32>
    %28 = tpu.matmul %24, %27, %cst_17 {dimension_numbers = #tpu.dot_dimension_numbers<[1], [0], [0], [1], [0, 0, 1, 1], [], []>} : vector<8x128xf32>, vector<128x128xf32>, vector<8x128xf32> -> vector<8x128xf32>
    %29 = arith.index_cast %c0_i32 : i32 to index
    %c0_18 = arith.constant 0 : index
    %c0_19 = arith.constant 0 : index
    %30 = vector.load %arg6[%29, %c0_18, %c0_19] : memref<2x1x128xf32, #tpu.memory_space<vmem>>, vector<1x1x128xf32>
    %31 = vector.shape_cast %30 : vector<1x1x128xf32> to vector<1x128xf32>
    %32 = vector.broadcast %31 : vector<1x128xf32> to vector<8x128xf32>
    %33 = arith.addf %28, %32 : vector<8x128xf32>
    %cst_20 = arith.constant 0.000000e+00 : f32
    %34 = vector.broadcast %cst_20 : f32 to vector<8x128xf32>
    %35 = arith.maximumf %33, %34 : vector<8x128xf32>
    %36 = arith.index_cast %c0_i32 : i32 to index
    %c0_21 = arith.constant 0 : index
    %c0_22 = arith.constant 0 : index
    %37 = vector.load %arg7[%36, %c0_21, %c0_22] : memref<2x128x128xf32, #tpu.memory_space<vmem>>, vector<1x128x128xf32>
    %38 = vector.shape_cast %37 : vector<1x128x128xf32> to vector<128x128xf32>
    %cst_23 = arith.constant dense<0.000000e+00> : vector<8x128xf32>
    %39 = tpu.matmul %35, %38, %cst_23 {dimension_numbers = #tpu.dot_dimension_numbers<[1], [0], [0], [1], [0, 0, 1, 1], [], []>} : vector<8x128xf32>, vector<128x128xf32>, vector<8x128xf32> -> vector<8x128xf32>
    %40 = arith.index_cast %c0_i32 : i32 to index
    %c0_24 = arith.constant 0 : index
    %c0_25 = arith.constant 0 : index
    %41 = vector.load %arg8[%40, %c0_24, %c0_25] : memref<2x1x128xf32, #tpu.memory_space<vmem>>, vector<1x1x128xf32>
    %42 = vector.shape_cast %41 : vector<1x1x128xf32> to vector<1x128xf32>
    %43 = vector.broadcast %42 : vector<1x128xf32> to vector<8x128xf32>
    %44 = arith.addf %39, %43 : vector<8x128xf32>
    %45 = arith.addf %24, %44 : vector<8x128xf32>
    %c0_26 = arith.constant 0 : index
    %c0_27 = arith.constant 0 : index
    %46 = vector.load %arg9[%c0_26, %c0_27] : memref<8x128xf32, #tpu.memory_space<vmem>>, vector<8x128xf32>
    tpu.vector_store %arg9[%c0_26, %c0_27], %45 {strides = array<i32>} : memref<8x128xf32, #tpu.memory_space<vmem>>, vector<8x128xf32>,
    %c1_i32_28 = arith.constant 1 : i32
    %47 = arith.index_cast %c1_i32_28 : i32 to index
    %c0_29 = arith.constant 0 : index
    %c0_30 = arith.constant 0 : index
    %48 = vector.load %arg2[%47, %c0_29, %c0_30] : memref<2x8x8xf32, #tpu.memory_space<vmem>>, vector<1x8x8xf32>
    %49 = vector.shape_cast %48 : vector<1x8x8xf32> to vector<8x8xf32>
    %50 = arith.index_cast %c1_i32_28 : i32 to index
    %c0_31 = arith.constant 0 : index
    %c0_32 = arith.constant 0 : index
    %51 = vector.load %arg3[%50, %c0_31, %c0_32] : memref<2x1x128xf32, #tpu.memory_space<vmem>>, vector<1x1x128xf32>
    %52 = vector.shape_cast %51 : vector<1x1x128xf32> to vector<1x128xf32>
    %53 = arith.index_cast %c1_i32_28 : i32 to index
    %c0_33 = arith.constant 0 : index
    %c0_34 = arith.constant 0 : index
    %54 = vector.load %arg4[%53, %c0_33, %c0_34] : memref<2x8x128xf32, #tpu.memory_space<vmem>>, vector<1x8x128xf32>
    %55 = vector.shape_cast %54 : vector<1x8x128xf32> to vector<8x128xf32>
    %c0_i32_35 = arith.constant 0 : i32
    %c8_i32_36 = arith.constant 8 : i32
    %56 = arith.muli %c0_i32_35, %c8_i32_36 : i32
    %57 = tpu.assume_multiple %56, 8 : i32
    %58 = arith.index_cast %57 : i32 to index
    %c0_37 = arith.constant 0 : index
    %59 = vector.load %arg9[%58, %c0_37] : memref<8x128xf32, #tpu.memory_space<vmem>>, vector<8x128xf32>
    %cst_38 = arith.constant dense<0.000000e+00> : vector<8x128xf32>
    %60 = tpu.matmul %49, %59, %cst_38 {dimension_numbers = #tpu.dot_dimension_numbers<[1], [0], [0], [1], [0, 0, 1, 1], [], []>} : vector<8x8xf32>, vector<8x128xf32>, vector<8x128xf32> -> vector<8x128xf32>
    %61 = vector.broadcast %52 : vector<1x128xf32> to vector<8x128xf32>
    %62 = arith.mulf %60, %61 : vector<8x128xf32>
    %63 = arith.addf %62, %55 : vector<8x128xf32>
    %cst_39 = arith.constant 0.000000e+00 : f32
    %64 = vector.broadcast %cst_39 : f32 to vector<8x128xf32>
    %65 = arith.maximumf %63, %64 : vector<8x128xf32>
    %66 = arith.addf %59, %65 : vector<8x128xf32>
    %67 = arith.index_cast %57 : i32 to index
    %c0_40 = arith.constant 0 : index
    %68 = vector.load %arg9[%67, %c0_40] : memref<8x128xf32, #tpu.memory_space<vmem>>, vector<8x128xf32>
    tpu.vector_store %arg9[%67, %c0_40], %66 {strides = array<i32>} : memref<8x128xf32, #tpu.memory_space<vmem>>, vector<8x128xf32>,
    %c1_i32_41 = arith.constant 1 : i32
    %c0_42 = arith.constant 0 : index
    %c0_43 = arith.constant 0 : index
    %69 = vector.load %arg9[%c0_42, %c0_43] : memref<8x128xf32, #tpu.memory_space<vmem>>, vector<8x128xf32>
    %70 = arith.index_cast %c1_i32_28 : i32 to index
    %c0_44 = arith.constant 0 : index
    %c0_45 = arith.constant 0 : index
    %71 = vector.load %arg5[%70, %c0_44, %c0_45] : memref<2x128x128xf32, #tpu.memory_space<vmem>>, vector<1x128x128xf32>
    %72 = vector.shape_cast %71 : vector<1x128x128xf32> to vector<128x128xf32>
    %cst_46 = arith.constant dense<0.000000e+00> : vector<8x128xf32>
    %73 = tpu.matmul %69, %72, %cst_46 {dimension_numbers = #tpu.dot_dimension_numbers<[1], [0], [0], [1], [0, 0, 1, 1], [], []>} : vector<8x128xf32>, vector<128x128xf32>, vector<8x128xf32> -> vector<8x128xf32>
    %74 = arith.index_cast %c1_i32_28 : i32 to index
    %c0_47 = arith.constant 0 : index
    %c0_48 = arith.constant 0 : index
    %75 = vector.load %arg6[%74, %c0_47, %c0_48] : memref<2x1x128xf32, #tpu.memory_space<vmem>>, vector<1x1x128xf32>
    %76 = vector.shape_cast %75 : vector<1x1x128xf32> to vector<1x128xf32>
    %77 = vector.broadcast %76 : vector<1x128xf32> to vector<8x128xf32>
    %78 = arith.addf %73, %77 : vector<8x128xf32>
    %cst_49 = arith.constant 0.000000e+00 : f32
    %79 = vector.broadcast %cst_49 : f32 to vector<8x128xf32>
    %80 = arith.maximumf %78, %79 : vector<8x128xf32>
    %81 = arith.index_cast %c1_i32_28 : i32 to index
    %c0_50 = arith.constant 0 : index
    %c0_51 = arith.constant 0 : index
    %82 = vector.load %arg7[%81, %c0_50, %c0_51] : memref<2x128x128xf32, #tpu.memory_space<vmem>>, vector<1x128x128xf32>
    %83 = vector.shape_cast %82 : vector<1x128x128xf32> to vector<128x128xf32>
    %cst_52 = arith.constant dense<0.000000e+00> : vector<8x128xf32>
    %84 = tpu.matmul %80, %83, %cst_52 {dimension_numbers = #tpu.dot_dimension_numbers<[1], [0], [0], [1], [0, 0, 1, 1], [], []>} : vector<8x128xf32>, vector<128x128xf32>, vector<8x128xf32> -> vector<8x128xf32>
    %85 = arith.index_cast %c1_i32_28 : i32 to index
    %c0_53 = arith.constant 0 : index
    %c0_54 = arith.constant 0 : index
    %86 = vector.load %arg8[%85, %c0_53, %c0_54] : memref<2x1x128xf32, #tpu.memory_space<vmem>>, vector<1x1x128xf32>
    %87 = vector.shape_cast %86 : vector<1x1x128xf32> to vector<1x128xf32>
    %88 = vector.broadcast %87 : vector<1x128xf32> to vector<8x128xf32>
    %89 = arith.addf %84, %88 : vector<8x128xf32>
    %90 = arith.addf %69, %89 : vector<8x128xf32>
    %c0_55 = arith.constant 0 : index
    %c0_56 = arith.constant 0 : index
    %91 = vector.load %arg9[%c0_55, %c0_56] : memref<8x128xf32, #tpu.memory_space<vmem>>, vector<8x128xf32>
    tpu.vector_store %arg9[%c0_55, %c0_56], %90 {strides = array<i32>} : memref<8x128xf32, #tpu.memory_space<vmem>>, vector<8x128xf32>,
    %c2_i32 = arith.constant 2 : i32
    return
  }
  func.func @transform_0(%arg0: i32) -> (i32, i32) {
    %c0_i32 = arith.constant 0 : i32
    %c0_i32_0 = arith.constant 0 : i32
    return %arg0, %c0_i32 : i32, i32
  }
  func.func @transform_1(%arg0: i32) -> (i32, i32, i32) {
    %c0_i32 = arith.constant 0 : i32
    %c0_i32_0 = arith.constant 0 : i32
    %c0_i32_1 = arith.constant 0 : i32
    %c0_i32_2 = arith.constant 0 : i32
    return %c0_i32, %c0_i32_0, %c0_i32_1 : i32, i32, i32
  }
  func.func @transform_2(%arg0: i32) -> (i32, i32, i32) {
    %c0_i32 = arith.constant 0 : i32
    %c0_i32_0 = arith.constant 0 : i32
    %c0_i32_1 = arith.constant 0 : i32
    %c0_i32_2 = arith.constant 0 : i32
    return %c0_i32, %c0_i32_0, %c0_i32_1 : i32, i32, i32
  }
  func.func @transform_3(%arg0: i32) -> (i32, i32, i32) {
    %c0_i32 = arith.constant 0 : i32
    %c0_i32_0 = arith.constant 0 : i32
    %c0_i32_1 = arith.constant 0 : i32
    %c0_i32_2 = arith.constant 0 : i32
    return %c0_i32, %c0_i32_0, %c0_i32_1 : i32, i32, i32
  }
  func.func @transform_4(%arg0: i32) -> (i32, i32, i32) {
    %c0_i32 = arith.constant 0 : i32
    %c0_i32_0 = arith.constant 0 : i32
    %c0_i32_1 = arith.constant 0 : i32
    %c0_i32_2 = arith.constant 0 : i32
    return %c0_i32, %c0_i32_0, %c0_i32_1 : i32, i32, i32
  }
  func.func @transform_5(%arg0: i32) -> (i32, i32, i32) {
    %c0_i32 = arith.constant 0 : i32
    %c0_i32_0 = arith.constant 0 : i32
    %c0_i32_1 = arith.constant 0 : i32
    %c0_i32_2 = arith.constant 0 : i32
    return %c0_i32, %c0_i32_0, %c0_i32_1 : i32, i32, i32
  }
  func.func @transform_6(%arg0: i32) -> (i32, i32, i32) {
    %c0_i32 = arith.constant 0 : i32
    %c0_i32_0 = arith.constant 0 : i32
    %c0_i32_1 = arith.constant 0 : i32
    %c0_i32_2 = arith.constant 0 : i32
    return %c0_i32, %c0_i32_0, %c0_i32_1 : i32, i32, i32
  }
  func.func @transform_7(%arg0: i32) -> (i32, i32, i32) {
    %c0_i32 = arith.constant 0 : i32
    %c0_i32_0 = arith.constant 0 : i32
    %c0_i32_1 = arith.constant 0 : i32
    %c0_i32_2 = arith.constant 0 : i32
    return %c0_i32, %c0_i32_0, %c0_i32_1 : i32, i32, i32
  }
  func.func @transform_8(%arg0: i32) -> (i32, i32) {
    %c0_i32 = arith.constant 0 : i32
    %c0_i32_0 = arith.constant 0 : i32
    return %arg0, %c0_i32 : i32, i32
  }
}

</mosaic_0001>

<bundles_post_ra>
// kernel: tile.51
= control target key start
LH: loop header
LB: loop body
LE: loop exit
PB: predicated region body
PF: predicated region fallthrough
CT: control target
= control target key end

     0   :  { %s22_s0 = inlined_call_operand.vmem [shape: f32[32], index: 0, kind: input, shape index: {}]   ;;  %s23_s1 = inlined_call_operand.vmem [shape: f32[4,32], index: 1, kind: output, shape index: {}]  }
   0x1   :  { %v4_v0 = vld [vmem:[%s22_s0] ss:$0 sm:$0xff] }
   0x2   :  { %5 = vst [vmem:[%s23_s1] sm:$0xf] %v4_v0 }

// kernel: tile.76
= control target key start
LH: loop header
LB: loop body
LE: loop exit
PB: predicated region body
PF: predicated region fallthrough
CT: control target
= control target key end

     0   :  { %vm7_vm0 = vcmask 261120   ;;  %s37_s8 = smov 32   ;;  %s38_s9 = smov 64   ;;  %vm13_vm1 = vcmask 1048320   ;;  %vm19_vm2 = vcmask 785920   ;;  %vm25_vm3 = vcmask 523520   ;;  %s55_s0 = inlined_call_operand.vmem [shape: f32[4,32], index: 0, kind: input, shape index: {}]   ;;  %s56_s1 = inlined_call_operand.vmem [shape: f32[1,1,128], index: 1, kind: output, shape index: {}]  }
   0x1   :  { %v4_v0 = vld [vmem:[%s55_s0] sm:$0xf]  ;;  %s36_s0 = smov 96  }
   0x2   :  { %5 = vst [vmem:[#allocation1] sm:$0xf] %v4_v0 }
   0x9   :  { %v10_v1 = vld [vmem:[#allocation1 + $0x3] sm:$0x1]   ;;  %v22_v2 = vld [vmem:[#allocation1 + $0x1] sm:$0x1]   ;;  %v6_v3 = vld [vmem:[#allocation1] sm:$0x1]  }
   0xa   :  { %11 = vrot.lane.b32.xlu0 %v10_v1, %s36_s0  ;;  %23 = vrot.lane.b32.xlu1 %v22_v2, %s37_s8  ;;  %v16_v4 = vld [vmem:[#allocation1 + $0x2] sm:$0x1]   ;;  %8 = vst.msk [vmem:[#allocation0] sm:$0x1] %vm7_vm0, %v6_v3  }
   0xe   :  { %17 = vrot.lane.b32.xlu0 %v16_v4, %s38_s9 }
  0x7c   :  { %v12_v5 = vpop.permute.xlu0 %11   ;;  %v24_v6 = vpop.permute.xlu1 %23  }
  0x7d   :  { %14 = vst.msk [vmem:[#allocation0] sm:$0x1] %vm13_vm1, %v12_v5  }
  0x80   :  { %v18_v7 = vpop.permute.xlu0 %17  }
  0x81   :  { %20 = vst.msk [vmem:[#allocation0] sm:$0x1] %vm19_vm2, %v18_v7  }
  0x82   :  { %26 = vst.msk [vmem:[#allocation0] sm:$0x1] %vm25_vm3, %v24_v6  }
  0x89   :  { %v30_v8 = vld [vmem:[#allocation0] sm:$0x1] }
  0x8a   :  { %32 = vst [vmem:[%s56_s1] sm:$0x1] %v30_v8 }

// kernel: tsmixer_forward_pallas.1
= control target key start
LH: loop header
LB: loop body
LE: loop exit
PB: predicated region body
PF: predicated region fallthrough
CT: control target
= control target key end

     0   :  { %vm35_vm0 = vcmask 64512   ;;  %v965_v0 = vmov 0.0   ;;  %vm966_vm1 = vmmov 0   ;;  %v967_v3 = vmov 0.0|0.0   ;;  %s1297_s0 = inlined_call_operand.vmem [shape: f32[8,128], index: 0, kind: input, shape index: {}, may-alias: {0,8}]   ;;  %s1298_s1 = inlined_call_operand.vmem [shape: f32[2,8,8], index: 1, kind: input, shape index: {}]   ;;  %s1299_s4 = inlined_call_operand.vmem [shape: f32[2,128,128], index: 4, kind: input, shape index: {}]   ;;  %s1300_s6 = inlined_call_operand.vmem [shape: f32[2,128,128], index: 6, kind: input, shape index: {}]   ;;  %s1301_s2 = inlined_call_operand.vmem [shape: f32[2,1,128], index: 2, kind: input, shape index: {}]   ;;  %s1302_s3 = inlined_call_operand.vmem [shape: f32[2,8,128], index: 3, kind: input, shape index: {}]   ;;  %s1303_s5 = inlined_call_operand.vmem [shape: f32[2,1,128], index: 5, kind: input, shape index: {}]   ;;  %s1304_s7 = inlined_call_operand.vmem [shape: f32[2,1,128], index: 7, kind: input, shape index: {}]   ;;  %s1305_s8 = inlined_call_operand.vmem [shape: f32[8,128], index: 8, kind: output, shape index: {}, may-alias: {0,8}]  }
   0x1   :  { %716 = vmatprep.subr.mxu0 %v965_v0  ;;  %v1017_v1 = vld [vmem:[%s1297_s0] sm:$0xff]  ;;  %718 = vmatprep.mubr.msk.f32.mxu0 %vm966_vm1, %v965_v0  ;;  %v122_v5 = vld [vmem:[%s1299_s4 + $0x8] sm:$0xff]  ;;  %v123_v6 = vld [vmem:[%s1299_s4 + $0x10] sm:$0xff] }
   0x2   :  { %v31_v2 = vld [vmem:[%s1298_s1] sm:$0xff]  ;;  %717 = vmatpush3.msra.mxu0 %v1017_v1  ;;  %866 = vmatprep.subr.bf16.mxu1 %v967_v3  ;;  %v124_v8 = vld [vmem:[%s1299_s4 + $0x18] sm:$0xff]  ;;  %v126_v11 = vld [vmem:[%s1299_s4 + $0x28] sm:$0xff] }
   0x3   :  { %v121_v4 = vld [vmem:[%s1299_s4] sm:$0xff]  ;;  %719 = vmatmul.mubr.msk.f32.vlgmr.msra.gmra.mrb[0].mxu0 %vm35_vm0, %v31_v2  ;;  %753 = vmatprep.mubr.msk.f32.mxu1 %vm966_vm1, %v965_v0  ;;  %v870_v9 = vpack.c.bf16 %v124_v8, %v123_v6  ;;  %v127_v13 = vld [vmem:[%s1299_s4 + $0x30] sm:$0xff]  ;;  %v128_v14 = vld [vmem:[%s1299_s4 + $0x38] sm:$0xff] }
   0x4   :  { %v867_v7 = vpack.c.bf16 %v122_v5, %v121_v4  ;;  %890 = vmatprep.subr.bf16.mxu0 %v967_v3  ;;  %788 = vmatprep.mubr.msk.f32.mxu0 %vm966_vm1, %v965_v0  ;;  %v125_v10 = vld [vmem:[%s1299_s4 + $0x20] sm:$0xff]  ;;  %v876_v15 = vpack.c.bf16 %v128_v14, %v127_v13  ;;  %v130_v17 = vld [vmem:[%s1299_s4 + $0x48] sm:$0xff]  ;;  %v131_v19 = vld [vmem:[%s1299_s4 + $0x50] sm:$0xff] }
   0x5   :  { %v873_v12 = vpack.c.bf16 %v126_v11, %v125_v10  ;;  %v129_v16 = vld [vmem:[%s1299_s4 + $0x40] sm:$0xff]  ;;  %v132_v20 = vld [vmem:[%s1299_s4 + $0x58] sm:$0xff]  ;;  %v134_v23 = vld [vmem:[%s1299_s4 + $0x68] sm:$0xff] }
   0x6   :  { %868 = vmatpush3.bf16.msra.mxu1 %v867_v7  ;;  %v879_v18 = vpack.c.bf16 %v130_v17, %v129_v16  ;;  %v882_v21 = vpack.c.bf16 %v132_v20, %v131_v19  ;;  %v133_v22 = vld [vmem:[%s1299_s4 + $0x60] sm:$0xff]  ;;  %v135_v25 = vld [vmem:[%s1299_s4 + $0x70] sm:$0xff]  ;;  %v136_v26 = vld [vmem:[%s1299_s4 + $0x78] sm:$0xff] }
   0x7   :  { %869 = vmatprep.subr.bf16.mxu1 %v967_v3  ;;  %v885_v24 = vpack.c.bf16 %v134_v23, %v133_v22  ;;  %v888_v27 = vpack.c.bf16 %v136_v26, %v135_v25  ;;  %v215_v28 = vld [vmem:[%s1300_s6] sm:$0xff]  ;;  %v216_v29 = vld [vmem:[%s1300_s6 + $0x8] sm:$0xff]  ;;  %v217_v30 = vld [vmem:[%s1300_s6 + $0x10] sm:$0xff] }
   0x8   :  { %v891_v31 = vpack.c.bf16 %v216_v29, %v215_v28  ;;  %v218_v32 = vld [vmem:[%s1300_s6 + $0x18] sm:$0xff]  ;;  %v219_v34 = vld [vmem:[%s1300_s6 + $0x20] sm:$0xff]  ;;  %v220_v35 = vld [vmem:[%s1300_s6 + $0x28] sm:$0xff] }
   0x9   :  { %v894_v33 = vpack.c.bf16 %v218_v32, %v217_v30  ;;  %v897_v36 = vpack.c.bf16 %v220_v35, %v219_v34  ;;  %v221_v37 = vld [vmem:[%s1300_s6 + $0x30] sm:$0xff]  ;;  %v222_v38 = vld [vmem:[%s1300_s6 + $0x38] sm:$0xff]  ;;  %v223_v40 = vld [vmem:[%s1300_s6 + $0x40] sm:$0xff] }
   0xa   :  { %871 = vmatpush3.bf16.msra.mxu1 %v870_v9  ;;  %892 = vmatpush3.bf16.msra.mxu0 %v891_v31  ;;  %v900_v39 = vpack.c.bf16 %v222_v38, %v221_v37  ;;  %v224_v41 = vld [vmem:[%s1300_s6 + $0x48] sm:$0xff]  ;;  %v225_v43 = vld [vmem:[%s1300_s6 + $0x50] sm:$0xff]  ;;  %v226_v44 = vld [vmem:[%s1300_s6 + $0x58] sm:$0xff] }
   0xb   :  { %872 = vmatprep.subr.bf16.mxu1 %v967_v3  ;;  %893 = vmatprep.subr.bf16.mxu0 %v967_v3  ;;  %v903_v42 = vpack.c.bf16 %v224_v41, %v223_v40  ;;  %v906_v45 = vpack.c.bf16 %v226_v44, %v225_v43  ;;  %v227_v46 = vld [vmem:[%s1300_s6 + $0x60] sm:$0xff]  ;;  %v228_v47 = vld [vmem:[%s1300_s6 + $0x68] sm:$0xff]  ;;  %v229_v57 = vld [vmem:[%s1300_s6 + $0x70] sm:$0xff] }
   0xc   :  { %v909_v48 = vpack.c.bf16 %v228_v47, %v227_v46  ;;  %v600_v49 = vld [vmem:[%s1301_s2] ss:$0 sm:$0xff]  ;;  %v230_v58 = vld [vmem:[%s1300_s6 + $0x78] sm:$0xff]  ;;  %v609_v4 = vld [vmem:[%s1299_s4 + $0x88] sm:$0xff] }
   0xd   :  { %v33_v50 = vld [vmem:[%s1302_s3] sm:$0xff]  ;;  %v912_v59 = vpack.c.bf16 %v230_v58, %v229_v57  ;;  %v610_v5 = vld [vmem:[%s1299_s4 + $0x90] sm:$0xff]  ;;  %v611_v7 = vld [vmem:[%s1299_s4 + $0x98] sm:$0xff] }
   0xe   :  { %874 = vmatpush3.bf16.msra.mxu1 %v873_v12  ;;  %895 = vmatpush3.bf16.msra.mxu0 %v894_v33  ;;  %v601_v60 = vld [vmem:[%s1303_s5] ss:$0 sm:$0xff]  ;;  %v918_v8 = vpack.c.bf16 %v611_v7, %v610_v5  ;;  %v613_v10 = vld [vmem:[%s1299_s4 + $0xa8] sm:$0xff]  ;;  %v614_v12 = vld [vmem:[%s1299_s4 + $0xb0] sm:$0xff] }
   0xf   :  { %875 = vmatprep.subr.bf16.mxu1 %v967_v3  ;;  %896 = vmatprep.subr.bf16.mxu0 %v967_v3  ;;  %v608_v2 = vld [vmem:[%s1299_s4 + $0x80] sm:$0xff]  ;;  %v615_v13 = vld [vmem:[%s1299_s4 + $0xb8] sm:$0xff]  ;;  %v603_v19 = vld [vmem:[%s1298_s1 + $0x8] sm:$0xff] }
  0x10   :  { %v915_v6 = vpack.c.bf16 %v609_v4, %v608_v2  ;;  %v612_v9 = vld [vmem:[%s1299_s4 + $0xa0] sm:$0xff]  ;;  %v924_v14 = vpack.c.bf16 %v615_v13, %v614_v12  ;;  %v617_v22 = vld [vmem:[%s1299_s4 + $0xc8] sm:$0xff]  ;;  %v622_v29 = vld [vmem:[%s1299_s4 + $0xf0] sm:$0xff] }
  0x11   :  { %v921_v11 = vpack.c.bf16 %v613_v10, %v612_v9  ;;  %v620_v26 = vld [vmem:[%s1299_s4 + $0xe0] sm:$0xff]  ;;  %v623_v30 = vld [vmem:[%s1299_s4 + $0xf8] sm:$0xff]  ;;  %v627_v33 = vld [vmem:[%s1300_s6 + $0x88] sm:$0xff] }
  0x12   :  { %877 = vmatpush3.bf16.msra.mxu1 %v876_v15  ;;  %898 = vmatpush3.bf16.msra.mxu0 %v897_v36  ;;  %v602_v15 = vld [vmem:[%s1304_s7] ss:$0 sm:$0xff]  ;;  %v936_v31 = vpack.c.bf16 %v623_v30, %v622_v29  ;;  %v628_v34 = vld [vmem:[%s1300_s6 + $0x90] sm:$0xff]  ;;  %v629_v36 = vld [vmem:[%s1300_s6 + $0x98] sm:$0xff] }
  0x13   :  { %878 = vmatprep.subr.bf16.mxu1 %v967_v3  ;;  %899 = vmatprep.subr.bf16.mxu0 %v967_v3  ;;  %v626_v32 = vld [vmem:[%s1300_s6 + $0x80] sm:$0xff]  ;;  %v942_v37 = vpack.c.bf16 %v629_v36, %v628_v34  ;;  %v632_v41 = vld [vmem:[%s1300_s6 + $0xb0] sm:$0xff] }
  0x14   :  { %v939_v35 = vpack.c.bf16 %v627_v33, %v626_v32  ;;  %v630_v38 = vld [vmem:[%s1300_s6 + $0xa0] sm:$0xff]  ;;  %v636_v47 = vld [vmem:[%s1300_s6 + $0xd0] sm:$0xff] }
  0x15   :  { %v634_v44 = vld [vmem:[%s1300_s6 + $0xc0] sm:$0xff] }
  0x16   :  { %880 = vmatpush3.bf16.msra.mxu1 %v879_v18  ;;  %901 = vmatpush3.bf16.msra.mxu0 %v900_v39  ;;  %v631_v39 = vld [vmem:[%s1300_s6 + $0xa8] sm:$0xff] }
  0x17   :  { %881 = vmatprep.subr.bf16.mxu1 %v967_v3  ;;  %902 = vmatprep.subr.bf16.mxu0 %v967_v3  ;;  %v945_v40 = vpack.c.bf16 %v631_v39, %v630_v38 }
  0x1a   :  { %883 = vmatpush3.bf16.msra.mxu1 %v882_v21  ;;  %904 = vmatpush3.bf16.msra.mxu0 %v903_v42  ;;  %v616_v21 = vld [vmem:[%s1299_s4 + $0xc0] sm:$0xff]  ;;  %v633_v42 = vld [vmem:[%s1300_s6 + $0xb8] sm:$0xff] }
  0x1b   :  { %884 = vmatprep.subr.bf16.mxu1 %v967_v3  ;;  %905 = vmatprep.subr.bf16.mxu0 %v967_v3  ;;  %v927_v23 = vpack.c.bf16 %v617_v22, %v616_v21  ;;  %v948_v43 = vpack.c.bf16 %v633_v42, %v632_v41 }
  0x1e   :  { %886 = vmatpush3.bf16.msra.mxu1 %v885_v24  ;;  %907 = vmatpush3.bf16.msra.mxu0 %v906_v45  ;;  %v618_v24 = vld [vmem:[%s1299_s4 + $0xd0] sm:$0xff]  ;;  %v635_v45 = vld [vmem:[%s1300_s6 + $0xc8] sm:$0xff] }
  0x1f   :  { %887 = vmatprep.subr.bf16.mxu1 %v967_v3  ;;  %908 = vmatprep.subr.bf16.mxu0 %v967_v3  ;;  %v951_v46 = vpack.c.bf16 %v635_v45, %v634_v44 }
  0x22   :  { %889 = vmatpush3.bf16.msra.mxu1 %v888_v27  ;;  %910 = vmatpush3.bf16.msra.mxu0 %v909_v48  ;;  %v621_v27 = vld [vmem:[%s1299_s4 + $0xe8] sm:$0xff]  ;;  %v637_v48 = vld [vmem:[%s1300_s6 + $0xd8] sm:$0xff] }
  0x23   :  { %791 = vmatprep.subr.mxu1 %v965_v0  ;;  %911 = vmatprep.subr.bf16.mxu0 %v967_v3  ;;  %v933_v28 = vpack.c.bf16 %v621_v27, %v620_v26 }
  0x26   :  { %913 = vmatpush3.bf16.msra.mxu0 %v912_v59 }
  0x27   :  { %914 = vmatprep.subr.bf16.mxu0 %v967_v3 }
  0xd6   :  { %v105_v51 = vpop.f32.mrb[0].mxu0 }
  0xd7   :  { %v115_v52 = vmul.f32 %v600_v49, %v105_v51  ;;  %v720_v53 = vpop.f32.mrb[1].mxu0  ;;  %v954_v49 = vpack.c.bf16 %v637_v48, %v636_v47  ;;  %v639_v51 = vld [vmem:[%s1300_s6 + $0xe8] sm:$0xff] }
  0xd8   :  { %v607_v53 = vld [vmem:[%s1301_s2 + $0x1] ss:$0 sm:$0xff] }
  0xd9   :  { %v116_v54 = vadd.f32 %v115_v52, %v33_v50  ;;  %v638_v50 = vld [vmem:[%s1300_s6 + $0xe0] sm:$0xff] }
  0xda   :  { %v957_v52 = vpack.c.bf16 %v639_v51, %v638_v50 }
  0xdb   :  { %v117_v55 = vmax.f32 %v116_v54, 0.0  ;;  %v605_v54 = vld [vmem:[%s1302_s3 + $0x8] sm:$0xff] }
  0xdd   :  { %v118_v56 = vadd.f32 %v117_v55, %v1017_v1 }
  0xdf   :  { %754 = vmatmul.mubr.f32.vlgmr.msra.gmra.mrb[0].mxu1 %v118_v56 }
  0xe0   :  { %793 = vmatprep.mubr.msk.f32.mxu1 %vm966_vm1, %v965_v0 }
 0x1b2   :  { %v210_v61 = vpop.f32.mrb[0].mxu1 }
 0x1b3   :  { %v211_v62 = vadd.f32 %v601_v60, %v210_v61  ;;  %v755_v63 = vpop.f32.mrb[1].mxu1  ;;  %v641_v61 = vld [vmem:[%s1300_s6 + $0xf8] sm:$0xff] }
 0x1b4   :  { %v625_v63 = vld [vmem:[%s1303_s5 + $0x1] ss:$0 sm:$0xff] }
 0x1b5   :  { %v214_v1 = vmax.f32 %v211_v62, 0.0 }
 0x1b7   :  { %789 = vmatmul.mubr.f32.vlgmr.msra.gmra.mrb[2].mxu0 %v214_v1 }
 0x1b8   :  { %828 = vmatprep.mubr.msk.f32.mxu0 %vm966_vm1, %v965_v0  ;;  %916 = vmatpush3.bf16.msra.mxu0 %v915_v6  ;;  %v643_v6 = vld [vmem:[%s1304_s7 + $0x1] ss:$0 sm:$0xff] }
 0x1b9   :  { %917 = vmatprep.subr.bf16.mxu0 %v967_v3 }
 0x1bc   :  { %919 = vmatpush3.bf16.msra.mxu0 %v918_v8 }
 0x1bd   :  { %920 = vmatprep.subr.bf16.mxu0 %v967_v3 }
 0x1c0   :  { %922 = vmatpush3.bf16.msra.mxu0 %v921_v11 }
 0x1c1   :  { %923 = vmatprep.subr.bf16.mxu0 %v967_v3 }
 0x1c4   :  { %925 = vmatpush3.bf16.msra.mxu0 %v924_v14 }
 0x1c5   :  { %926 = vmatprep.subr.bf16.mxu0 %v967_v3 }
 0x1c8   :  { %928 = vmatpush3.bf16.msra.mxu0 %v927_v23 }
 0x1c9   :  { %929 = vmatprep.subr.bf16.mxu0 %v967_v3 }
 0x28a   :  { %v304_v16 = vpop.f32.mrb[2].mxu0 }
 0x28b   :  { %v305_v17 = vadd.f32 %v602_v15, %v304_v16  ;;  %v790_v18 = vpop.f32.mrb[3].mxu0 }
 0x28d   :  { %v1192_v20 = vadd.f32 %v305_v17, %v118_v56 }
 0x28f   :  { %792 = vmatpush3.msra.mxu1 %v1192_v20 }
 0x290   :  { %794 = vmatmul.mubr.msk.f32.vlgmr.msra.gmra.mrb[2].mxu1 %vm35_vm0, %v603_v19  ;;  %938 = vmatprep.subr.bf16.mxu1 %v967_v3 }
 0x291   :  { %863 = vmatprep.mubr.msk.f32.mxu1 %vm966_vm1, %v965_v0  ;;  %v619_v0 = vld [vmem:[%s1299_s4 + $0xd8] sm:$0xff]  ;;  %940 = vmatpush3.bf16.msra.mxu1 %v939_v35 }
 0x292   :  { %v930_v25 = vpack.c.bf16 %v619_v0, %v618_v24  ;;  %941 = vmatprep.subr.bf16.mxu1 %v967_v3 }
 0x294   :  { %931 = vmatpush3.bf16.msra.mxu0 %v930_v25 }
 0x295   :  { %932 = vmatprep.subr.bf16.mxu0 %v967_v3  ;;  %943 = vmatpush3.bf16.msra.mxu1 %v942_v37 }
 0x296   :  { %944 = vmatprep.subr.bf16.mxu1 %v967_v3 }
 0x298   :  { %934 = vmatpush3.bf16.msra.mxu0 %v933_v28 }
 0x299   :  { %935 = vmatprep.subr.bf16.mxu0 %v967_v3  ;;  %946 = vmatpush3.bf16.msra.mxu1 %v945_v40 }
 0x29a   :  { %947 = vmatprep.subr.bf16.mxu1 %v967_v3 }
 0x29c   :  { %937 = vmatpush3.bf16.msra.mxu0 %v936_v31 }
 0x29d   :  { %949 = vmatpush3.bf16.msra.mxu1 %v948_v43 }
 0x29e   :  { %950 = vmatprep.subr.bf16.mxu1 %v967_v3 }
 0x2a1   :  { %952 = vmatpush3.bf16.msra.mxu1 %v951_v46 }
 0x2a2   :  { %953 = vmatprep.subr.bf16.mxu1 %v967_v3 }
 0x2a5   :  { %955 = vmatpush3.bf16.msra.mxu1 %v954_v49 }
 0x2a6   :  { %956 = vmatprep.subr.bf16.mxu1 %v967_v3 }
 0x2a9   :  { %958 = vmatpush3.bf16.msra.mxu1 %v957_v52 }
 0x2aa   :  { %959 = vmatprep.subr.bf16.mxu1 %v967_v3  ;;  %v640_v3 = vld [vmem:[%s1300_s6 + $0xf0] sm:$0xff] }
 0x2ab   :  { %v960_v62 = vpack.c.bf16 %v641_v61, %v640_v3 }
 0x2ad   :  { %961 = vmatpush3.bf16.msra.mxu1 %v960_v62 }
 0x363   :  { %v386_v55 = vpop.f32.mrb[2].mxu1 }
 0x364   :  { %v396_v56 = vmul.f32 %v607_v53, %v386_v55  ;;  %v795_v57 = vpop.f32.mrb[3].mxu1 }
 0x366   :  { %v397_v58 = vadd.f32 %v605_v54, %v396_v56 }
 0x368   :  { %v398_v59 = vmax.f32 %v397_v58, 0.0 }
 0x36a   :  { %v399_v60 = vadd.f32 %v398_v59, %v1192_v20 }
 0x36c   :  { %829 = vmatmul.mubr.f32.vlgmr.msra.gmra.mrb[4].mxu0 %v399_v60 }
 0x43f   :  { %v493_v1 = vpop.f32.mrb[4].mxu0 }
 0x440   :  { %v494_v2 = vadd.f32 %v625_v63, %v493_v1  ;;  %v830_v4 = vpop.f32.mrb[5].mxu0 }
 0x442   :  { %v497_v5 = vmax.f32 %v494_v2, 0.0 }
 0x444   :  { %864 = vmatmul.mubr.f32.vlgmr.msra.gmra.mrb[4].mxu1 %v497_v5 }
 0x517   :  { %v589_v7 = vpop.f32.mrb[4].mxu1 }
 0x518   :  { %v590_v8 = vadd.f32 %v643_v6, %v589_v7  ;;  %v865_v9 = vpop.f32.mrb[5].mxu1 }
 0x51a   :  { %v593_v10 = vadd.f32 %v590_v8, %v399_v60 }
 0x51c   :  { %594 = vst [vmem:[%s1305_s8] sm:$0xff] %v593_v10 }

</bundles_post_ra>
